<compile_context>
chip_gen: v7x
topology: tpu7x:2x2x1
jax: 0.10.0
libtpu: 0.0.40
codegen_flags: <defaults>
</compile_context>

<pallas_src>
import math

import jax
import jax.numpy as jnp
from jax.experimental import pallas as pl
from jax.experimental.pallas import tpu as pltpu

_MIB = 1 << 20


def _sublane_multiple(dtype):
    return {4: 8, 2: 16, 1: 32}.get(jnp.dtype(dtype).itemsize, 8)


def _pick_tile(n, target, multiple, prefer=256):
    """Largest tile <= target dividing n, 256-aligned if possible, else
    `multiple`-aligned; falls back to the full dimension (always legal)."""
    if n <= target:
        return n
    for align in (max(prefer, multiple), multiple):
        start = (target // align) * align
        for t in range(start, 0, -align):
            if n % t == 0:
                return t
    return n


def _vmem_limit(block_bytes, scratch_bytes):
    # double-buffered pipeline blocks + resident scratch + headroom,
    # clamped to v7x physical VMEM.
    need = 2 * block_bytes + scratch_bytes + 4 * _MIB
    return int(min(64 * _MIB, max(16 * _MIB, need)))


# ---------------------------------------------------------------------------
# Tiled linear: y = x @ W + b      (W stored [d_in, d_out], streamed in tiles)
# ---------------------------------------------------------------------------
def _linear_kernel(x_ref, w_ref, b_ref, o_ref, acc_ref):
    k = pl.program_id(2)

    @pl.when(k == 0)
    def _():
        acc_ref[...] = jnp.zeros_like(acc_ref)

    acc_ref[...] += jnp.dot(x_ref[...], w_ref[...],
                            preferred_element_type=jnp.float32)

    @pl.when(k == pl.num_programs(2) - 1)
    def _():
        o_ref[...] = (acc_ref[...] + b_ref[...]).astype(o_ref.dtype)


def linear(x2d, w, b, *, tm_target=512, tn_target=512, tk_target=1024):
    """x2d: [M, d_in], w: [d_in, d_out], b: [d_out] -> [M, d_out]."""
    M, d_in = x2d.shape
    d_out = w.shape[1]
    dtype = x2d.dtype
    itemsize = jnp.dtype(dtype).itemsize
    sub = _sublane_multiple(dtype)

    tm = _pick_tile(M, tm_target, sub)          # sublane-facing row tile
    tn = _pick_tile(d_out, tn_target, 128)      # lane-facing output tile
    tk = _pick_tile(d_in, tk_target, 128)       # contraction tile
    b2d = b.reshape(1, d_out)

    block_bytes = itemsize * (tm * tk + tk * tn + tn + tm * tn)
    scratch_bytes = 4 * tm * tn
    cost = pl.CostEstimate(
        flops=2 * M * d_in * d_out,
        transcendentals=0,
        bytes_accessed=itemsize * (M * d_in + d_in * d_out + d_out + M * d_out),
    )

    return pl.pallas_call(
        _linear_kernel,
        out_shape=jax.ShapeDtypeStruct((M, d_out), dtype),
        grid_spec=pltpu.PrefetchScalarGridSpec(
            num_scalar_prefetch=0,
            grid=(M // tm, d_out // tn, d_in // tk),
            in_specs=[
                pl.BlockSpec((tm, tk), lambda i, j, k: (i, k)),   # x row tile
                pl.BlockSpec((tk, tn), lambda i, j, k: (k, j)),   # W slab
                pl.BlockSpec((1, tn), lambda i, j, k: (0, j)),    # bias slab
            ],
            out_specs=pl.BlockSpec((tm, tn), lambda i, j, k: (i, j)),
            scratch_shapes=[pltpu.VMEM((tm, tn), jnp.float32)],
        ),
        compiler_params=pltpu.CompilerParams(
            dimension_semantics=("parallel", "parallel", "arbitrary"),
            vmem_limit_bytes=_vmem_limit(block_bytes, scratch_bytes)),
        cost_estimate=cost,
    )(x2d, w, b2d)


# ---------------------------------------------------------------------------
# Flash-style scaled-dot-product attention over [B*H, S, Dh]
# (score scaling is pre-folded into the Q projection by the caller)
# ---------------------------------------------------------------------------
def _flash_kernel(q_ref, k_ref, v_ref, o_ref, m_sc, l_sc, acc_sc):
    kv = pl.program_id(2)

    @pl.when(kv == 0)
    def _():
        m_sc[...] = jnp.full_like(m_sc, -jnp.inf)
        l_sc[...] = jnp.zeros_like(l_sc)
        acc_sc[...] = jnp.zeros_like(acc_sc)

    q = q_ref[...]            # (tq, Dh)   2-D: leading batch dim squeezed
    k = k_ref[...]            # (tkv, Dh)
    v = v_ref[...]            # (tkv, Dh)

    # s = q @ k^T without materializing a transpose (NT dot on the MXU).
    s = jax.lax.dot_general(q, k, (((1,), (1,)), ((), ())),
                            preferred_element_type=jnp.float32)   # (tq, tkv)

    m_prev = m_sc[...]                                   # (tq, 128) lane-dense
    m_new = jnp.maximum(m_prev, s.max(axis=-1, keepdims=True))
    alpha = jnp.exp(m_prev - m_new)                      # (tq, 128)
    p = jnp.exp(s - m_new[:, 0:1])                       # (tq, tkv)

    l_sc[...] = alpha * l_sc[...] + p.sum(axis=-1, keepdims=True)
    acc_sc[...] = alpha[:, 0:1] * acc_sc[...] + jnp.dot(
        p.astype(v.dtype), v, preferred_element_type=jnp.float32)
    m_sc[...] = m_new

    @pl.when(kv == pl.num_programs(2) - 1)
    def _():
        inv_l = pl.reciprocal(l_sc[...], approx=True)[:, 0:1]
        o_ref[...] = (acc_sc[...] * inv_l).astype(o_ref.dtype)


def scaled_dot_product_attention(q, k, v, *, tq_target=256, tkv_target=256):
    """q: [BH, Sq, Dh], k/v: [BH, Skv, Dh] -> softmax(q k^T) v (q pre-scaled)."""
    BH, Sq, Dh = q.shape
    Skv = k.shape[1]
    dtype = q.dtype
    itemsize = jnp.dtype(dtype).itemsize
    sub = _sublane_multiple(dtype)

    tq = _pick_tile(Sq, tq_target, sub)
    tkv = _pick_tile(Skv, tkv_target, sub)

    block_bytes = itemsize * (2 * tq * Dh + 2 * tkv * Dh)
    scratch_bytes = 4 * (2 * tq * 128 + tq * Dh)
    cost = pl.CostEstimate(
        flops=4 * BH * Sq * Skv * Dh,
        transcendentals=2 * BH * Sq * Skv,
        bytes_accessed=itemsize * BH * (2 * Sq * Dh + 2 * Skv * Dh),
    )

    return pl.pallas_call(
        _flash_kernel,
        out_shape=jax.ShapeDtypeStruct((BH, Sq, Dh), dtype),
        grid_spec=pltpu.PrefetchScalarGridSpec(
            num_scalar_prefetch=0,
            grid=(BH, Sq // tq, Skv // tkv),
            in_specs=[
                pl.BlockSpec((None, tq, Dh), lambda b, qi, ki: (b, qi, 0)),
                pl.BlockSpec((None, tkv, Dh), lambda b, qi, ki: (b, ki, 0)),
                pl.BlockSpec((None, tkv, Dh), lambda b, qi, ki: (b, ki, 0)),
            ],
            out_specs=pl.BlockSpec((None, tq, Dh), lambda b, qi, ki: (b, qi, 0)),
            scratch_shapes=[
                pltpu.VMEM((tq, 128), jnp.float32),   # running max m (lane-dense)
                pltpu.VMEM((tq, 128), jnp.float32),   # running denom l
                pltpu.VMEM((tq, Dh), jnp.float32),    # output accumulator
            ],
        ),
        compiler_params=pltpu.CompilerParams(
            dimension_semantics=("parallel", "parallel", "arbitrary"),
            vmem_limit_bytes=_vmem_limit(block_bytes, scratch_bytes)),
        cost_estimate=cost,
    )(q, k, v)


# ---------------------------------------------------------------------------
# Full MultiHeadAttention forward
# ---------------------------------------------------------------------------
def multi_head_attention(q, k, v, wq, bq, wk, bk, wv, bv, wo, bo, num_heads):
    """q: [B, Sq, D], k/v: [B, Skv, D] -> [B, Sq, D]."""
    B, Sq, D = q.shape
    Skv = k.shape[1]
    H = num_heads
    Dh = D // H
    scale = 1.0 / math.sqrt(Dh)

    # Fold 1/sqrt(Dh) into the Q projection (free; removes the per-step
    # score scaling from the flash inner loop).
    wq_s, bq_s = wq * scale, bq * scale

    if (q is k) and (k is v):
        # Self-attention: fused [D, 3D] projection — activation read once.
        w_qkv = jnp.concatenate([wq_s, wk, wv], axis=1)      # [D, 3D]
        b_qkv = jnp.concatenate([bq_s, bk, bv], axis=0)      # [3D]
        y = linear(q.reshape(B * Sq, D), w_qkv, b_qkv)        # [B*Sq, 3D]
        qkv = (y.reshape(B, Sq, 3, H, Dh)
                 .transpose(2, 0, 3, 1, 4)                    # [3, B, H, S, Dh]
                 .reshape(3, B * H, Sq, Dh))
        qh, kh, vh = qkv[0], qkv[1], qkv[2]
    else:
        # Cross-attention: q/k/v are genuinely different activations.
        def to_heads(x, w, b, S):
            y = linear(x.reshape(B * S, D), w, b)
            return (y.reshape(B, S, H, Dh)
                      .transpose(0, 2, 1, 3)
                      .reshape(B * H, S, Dh))
        qh = to_heads(q, wq_s, bq_s, Sq)
        kh = to_heads(k, wk, bk, Skv)
        vh = to_heads(v, wv, bv, Skv)

    ctx = scaled_dot_product_attention(qh, kh, vh)            # [B*H, Sq, Dh]

    ctx = (ctx.reshape(B, H, Sq, Dh)
              .transpose(0, 2, 1, 3)
              .reshape(B * Sq, D))
    out = linear(ctx, wo, bo)
    return out.reshape(B, Sq, D)


if __name__ == "__main__":
    batch, seq, d_model, num_heads = 2, 8, 32, 4
    head_dim = d_model // num_heads
    kv_seq = 16

    key = jax.random.PRNGKey(0)
    ks = jax.random.split(key, 11)
    wscale = 0.1

    x = jax.random.normal(ks[0], (batch, seq, d_model), dtype=jnp.float32)
    kx = jax.random.normal(ks[1], (batch, kv_seq, d_model), dtype=jnp.float32)
    vx = jax.random.normal(ks[2], (batch, kv_seq, d_model), dtype=jnp.float32)

    # nn.Linear weights stored transposed ([d_in, d_out])
    wq = jax.random.normal(ks[3], (d_model, d_model), jnp.float32) * wscale
    bq = jax.random.normal(ks[4], (d_model,), jnp.float32) * wscale
    wk = jax.random.normal(ks[5], (d_model, d_model), jnp.float32) * wscale
    bk = jax.random.normal(ks[6], (d_model,), jnp.float32) * wscale
    wv = jax.random.normal(ks[7], (d_model, d_model), jnp.float32) * wscale
    bv = jax.random.normal(ks[8], (d_model,), jnp.float32) * wscale
    wo = jax.random.normal(ks[9], (d_model, d_model), jnp.float32) * wscale
    bo = jax.random.normal(ks[10], (d_model,), jnp.float32) * wscale

    # Pure-JAX reference (same math as the PyTorch module with mask=None).
    def reference(qx, kxx, vxx):
        def proj(xx, w, b):
            B, S, _ = xx.shape
            return ((xx.reshape(B * S, d_model) @ w + b)
                    .reshape(B, S, num_heads, head_dim)
                    .transpose(0, 2, 1, 3))
        qp, kp, vp = proj(qx, wq, bq), proj(kxx, wk, bk), proj(vxx, wv, bv)
        scores = jnp.einsum("bhqd,bhkd->bhqk", qp, kp) / jnp.sqrt(
            jnp.float32(head_dim))
        attn = jax.nn.softmax(scores, axis=-1)
        ctx = jnp.einsum("bhqk,bhkd->bhqd", attn, vp)
        B = ctx.shape[0]
        ctx = ctx.transpose(0, 2, 1, 3).reshape(B, -1, d_model)
        return ctx @ wo + bo

    # Self-attention (exercises the fused QKV projection path).
    out_self = multi_head_attention(x, x, x, wq, bq, wk, bk, wv, bv, wo, bo,
                                    num_heads)
    jax.block_until_ready(out_self)
    ref_self = reference(x, x, x)
    assert out_self.shape == (batch, seq, d_model)
    assert jnp.allclose(out_self, ref_self, atol=2e-3, rtol=2e-3), \
        float(jnp.max(jnp.abs(out_self - ref_self)))

    # Cross-attention (separate projections, different kv length).
    out_cross = multi_head_attention(x, kx, vx, wq, bq, wk, bk, wv, bv, wo, bo,
                                     num_heads)
    jax.block_until_ready(out_cross)
    ref_cross = reference(x, kx, vx)
    assert out_cross.shape == (batch, seq, d_model)
    assert jnp.allclose(out_cross, ref_cross, atol=2e-3, rtol=2e-3), \
        float(jnp.max(jnp.abs(out_cross - ref_cross)))

    print("KERNEL_OK")
</pallas_src>

<mosaic_0001>
module attributes {stable_mosaic.version = 11 : i64} {
  func.func @_linear_kernel(%arg0: i32, %arg1: i32, %arg2: i32, %arg3: memref<16x32xf32, #tpu.memory_space<vmem>>, %arg4: memref<32x96xf32, #tpu.memory_space<vmem>>, %arg5: memref<1x96xf32, #tpu.memory_space<vmem>>, %arg6: memref<16x96xf32, #tpu.memory_space<vmem>>, %arg7: memref<16x96xf32, #tpu.memory_space<vmem>>) attributes {dimension_semantics = [#tpu.dimension_semantics<parallel>, #tpu.dimension_semantics<parallel>, #tpu.dimension_semantics<arbitrary>], iteration_bounds = array<i64: 1, 1, 1>, scalar_prefetch = 0 : i64, scratch_operands = 1 : i64, tpu.core_type = #tpu.core_type<tc>, window_params = [{transform_indices = @transform_0, window_bounds = array<i64: 16, 32>}, {transform_indices = @transform_1, window_bounds = array<i64: 32, 96>}, {transform_indices = @transform_2, window_bounds = array<i64: 1, 96>}, {transform_indices = @transform_3, window_bounds = array<i64: 16, 96>}]} {
    %c0_i32 = arith.constant 0 : i32
    %0 = arith.cmpi eq, %arg2, %c0_i32 : i32
    %1 = arith.extui %0 : i1 to i32
    %c0_i32_0 = arith.constant 0 : i32
    %2 = arith.cmpi ne, %1, %c0_i32_0 : i32
    scf.if %2 {
      %cst_10 = arith.constant 0.000000e+00 : f32
      %12 = vector.broadcast %cst_10 : f32 to vector<16x96xf32>
      %c0_11 = arith.constant 0 : index
      %c0_12 = arith.constant 0 : index
      %13 = vector.load %arg7[%c0_11, %c0_12] : memref<16x96xf32, #tpu.memory_space<vmem>>, vector<16x96xf32>
      tpu.vector_store %arg7[%c0_11, %c0_12], %12 {strides = array<i32>} : memref<16x96xf32, #tpu.memory_space<vmem>>, vector<16x96xf32>,
    } else {
    }
    %c0 = arith.constant 0 : index
    %c0_1 = arith.constant 0 : index
    %3 = vector.load %arg7[%c0, %c0_1] : memref<16x96xf32, #tpu.memory_space<vmem>>, vector<16x96xf32>
    %c0_2 = arith.constant 0 : index
    %c0_3 = arith.constant 0 : index
    %4 = vector.load %arg3[%c0_2, %c0_3] : memref<16x32xf32, #tpu.memory_space<vmem>>, vector<16x32xf32>
    %c0_4 = arith.constant 0 : index
    %c0_5 = arith.constant 0 : index
    %5 = vector.load %arg4[%c0_4, %c0_5] : memref<32x96xf32, #tpu.memory_space<vmem>>, vector<32x96xf32>
    %cst = arith.constant dense<0.000000e+00> : vector<16x96xf32>
    %6 = tpu.matmul %4, %5, %cst {dimension_numbers = #tpu.dot_dimension_numbers<[1], [0], [0], [1], [0, 0, 1, 1], [], []>} : vector<16x32xf32>, vector<32x96xf32>, vector<16x96xf32> -> vector<16x96xf32>
    %7 = arith.addf %3, %6 : vector<16x96xf32>
    %c0_6 = arith.constant 0 : index
    %c0_7 = arith.constant 0 : index
    %8 = vector.load %arg7[%c0_6, %c0_7] : memref<16x96xf32, #tpu.memory_space<vmem>>, vector<16x96xf32>
    tpu.vector_store %arg7[%c0_6, %c0_7], %7 {strides = array<i32>} : memref<16x96xf32, #tpu.memory_space<vmem>>, vector<16x96xf32>,
    %c0_i32_8 = arith.constant 0 : i32
    %9 = arith.cmpi eq, %arg2, %c0_i32_8 : i32
    %10 = arith.extui %9 : i1 to i32
    %c0_i32_9 = arith.constant 0 : i32
    %11 = arith.cmpi ne, %10, %c0_i32_9 : i32
    scf.if %11 {
      %c0_10 = arith.constant 0 : index
      %c0_11 = arith.constant 0 : index
      %12 = vector.load %arg7[%c0_10, %c0_11] : memref<16x96xf32, #tpu.memory_space<vmem>>, vector<16x96xf32>
      %c0_12 = arith.constant 0 : index
      %c0_13 = arith.constant 0 : index
      %13 = vector.load %arg5[%c0_12, %c0_13] : memref<1x96xf32, #tpu.memory_space<vmem>>, vector<1x96xf32>
      %14 = vector.broadcast %13 : vector<1x96xf32> to vector<16x96xf32>
      %15 = arith.addf %12, %14 : vector<16x96xf32>
      %c0_14 = arith.constant 0 : index
      %c0_15 = arith.constant 0 : index
      %16 = vector.load %arg6[%c0_14, %c0_15] : memref<16x96xf32, #tpu.memory_space<vmem>>, vector<16x96xf32>
      tpu.vector_store %arg6[%c0_14, %c0_15], %15 {strides = array<i32>} : memref<16x96xf32, #tpu.memory_space<vmem>>, vector<16x96xf32>,
    } else {
    }
    return
  }
  func.func @transform_0(%arg0: i32, %arg1: i32, %arg2: i32) -> (i32, i32) {
    %c0_i32 = arith.constant 0 : i32
    return %arg0, %arg2 : i32, i32
  }
  func.func @transform_1(%arg0: i32, %arg1: i32, %arg2: i32) -> (i32, i32) {
    %c0_i32 = arith.constant 0 : i32
    return %arg2, %arg1 : i32, i32
  }
  func.func @transform_2(%arg0: i32, %arg1: i32, %arg2: i32) -> (i32, i32) {
    %c0_i32 = arith.constant 0 : i32
    %c0_i32_0 = arith.constant 0 : i32
    return %c0_i32, %arg1 : i32, i32
  }
  func.func @transform_3(%arg0: i32, %arg1: i32, %arg2: i32) -> (i32, i32) {
    %c0_i32 = arith.constant 0 : i32
    return %arg0, %arg1 : i32, i32
  }
}

</mosaic_0001>

<bundles_post_ra>
// kernel: tpu_custom_call.1
= control target key start
LH: loop header
LB: loop body
LE: loop exit
PB: predicated region body
PF: predicated region fallthrough
CT: control target
= control target key end

     0   :  { %8 = vsyncpa [#allocation4], 0  ;;  %s365_s0 = inlined_call_operand.hbm [shape: f32[16,32], index: 0, kind: input, shape index: {}]   ;;  %s366_s1 = inlined_call_operand.hbm [shape: f32[32,96], index: 1, kind: input, shape index: {}]   ;;  %s367_s2 = inlined_call_operand.vmem [shape: f32[1,96], index: 2, kind: input, shape index: {}]   ;;  %s368_s3 = inlined_call_operand.hbm [shape: f32[16,96], index: 3, kind: output, shape index: {}]  }
   0x1   :  { %9 = vsyncpa [#allocation7], 0 }
   0x2   :  { %10 = vsyncpa [#allocation5], 0  ;;  %s285_s12 = smov [#allocation3]   ;;  %s213_s16 = scalar_lea.hbm %s365_s0, 256 }
   0x3   :  { %s16_s13 = sshll.u32 %s285_s12, 4  ;;  %p214_p0 = scmp.ne.s32.totalorder %s365_s0, %s213_s16  ;;  %s17_s13 = int_to_ptr.vmem [resolvable:$true] %s16_s13 }
   0x4   :  { %p217_p1 = scmp.lt.u32.totalorder %s213_s16, %s365_s0 }
   0x6   :  { %p219_p2 = pnand %p217_p1, %p214_p0 }
   0x8   :  { %222 = shalt.err (!%p219_p2)
}
   0x9   :  { %s223_s21 = scalar_lea.vmem %s17_s13, 256  ;;  %p228_p4 = scmp.lt.s32.totalorder %s17_s13, %s17_s13 }
   0xa   :  { %p224_p3 = scmp.ne.s32.totalorder %s17_s13, %s223_s21  ;;  %p229_p5 = scmp.lt.s32.totalorder %s223_s21, %s223_s21 }
   0xc   :  { %p230_p6 = por %p229_p5, %p228_p4 }
   0xe   :  { %p231_p7 = pnand %p230_p6, %p224_p3 }
  0x10   :  { %234 = shalt.err (!%p231_p7)
}
  0x11   :  { %s286_s22 = smov 128   ;;  %s287_s23 = smov 8  }
  0x12   :  { %22 = dma.hbm_to_vmem [thread:$0]  %s365_s0, 256, %s17_s13, [#allocation4], %s286_s22, %s286_s22, %s287_s23  }
  0x13   :  { %s288_s26 = smov [#allocation6]   ;;  %s235_s30 = scalar_lea.hbm %s366_s1, 512 }
  0x14   :  { %s28_s27 = sshll.u32 %s288_s26, 4  ;;  %p236_p8 = scmp.ne.s32.totalorder %s366_s1, %s235_s30  ;;  %s29_s27 = int_to_ptr.vmem [resolvable:$true] %s28_s27 }
  0x15   :  { %p239_p9 = scmp.lt.u32.totalorder %s235_s30, %s366_s1 }
  0x17   :  { %p241_p10 = pnand %p239_p9, %p236_p8 }
  0x19   :  { %244 = shalt.err (!%p241_p10)
}
  0x1a   :  { %s245_s8 = scalar_lea.vmem %s29_s27, 512  ;;  %p250_p12 = scmp.lt.s32.totalorder %s29_s27, %s29_s27 }
  0x1b   :  { %p246_p11 = scmp.ne.s32.totalorder %s29_s27, %s245_s8  ;;  %p251_p13 = scmp.lt.s32.totalorder %s245_s8, %s245_s8 }
  0x1d   :  { %p252_p0 = por %p251_p13, %p250_p12 }
  0x1f   :  { %p253_p1 = pnand %p252_p0, %p246_p11 }
  0x21   :  { %256 = shalt.err (!%p253_p1)
}
  0x22   :  { %34 = dma.hbm_to_vmem [thread:$0]  %s366_s1, 512, %s29_s27, [#allocation7], %s286_s22, %s286_s22, %s287_s23  }
  0x23   :  { %279 = dma.done.wait [#allocation4], 256  }
  0x24   :  { %280 = vsyncadd [#allocation4], 4294967040 }
  0x25   :  { %281 = dma.done.wait [#allocation7], 512  }
  0x26   :  { %282 = vsyncadd [#allocation7], 4294966784  ;;  %vm47_vm0 = vcmask 785408   ;;  %v289_v0 = vmov 0.0   ;;  %vm58_vm1 = vcmask 261120   ;;  %v54_v1 = vld [vmem:[#allocation6] sm:$0xff] }
  0x27   :  { %49 = vst.msk [vmem:[#allocation2 + $0x8] sm:$0xff] %vm47_vm0, %v289_v0  ;;  %48 = vst.msk [vmem:[#allocation2] sm:$0xff] %vm47_vm0, %v289_v0  ;;  %v55_v2 = vld [vmem:[#allocation6 + $0x8] sm:$0xff]  ;;  %v56_v3 = vld [vmem:[#allocation6 + $0x10] sm:$0xff]  ;;  %s290_s11 = smov [#allocation8]  }
  0x28   :  { %v199_v4 = vpack.c.bf16 %v55_v2, %v54_v1  ;;  %v57_v5 = vld [vmem:[#allocation6 + $0x18] sm:$0xff]  ;;  %v52_v6 = vld [vmem:[#allocation3] sm:$0xff]  ;;  %v181_v15 = vld [vmem:[%s367_s2] ss:$0 sm:$0xff]  ;;  %s166_s12 = sshll.u32 %s290_s11, 4  ;;  %s167_s12 = int_to_ptr.vmem [resolvable:$true] %s166_s12 }
  0x29   :  { %v203_v7 = vpack.c.bf16 %v57_v5, %v56_v3  ;;  %196 = vmatprep.mubr.msk.f32.mxu0 %vm58_vm1, %v52_v6  ;;  %v53_v8 = vld [vmem:[#allocation3 + $0x8] sm:$0xff]  ;;  %s257_s13 = scalar_lea.vmem %s167_s12, 256  ;;  %p262_p3 = scmp.lt.s32.totalorder %s167_s12, %s167_s12 }
  0x2a   :  { %200 = vmatprep.subr.bf16.mxu0 %v199_v4  ;;  %p258_p2 = scmp.ne.s32.totalorder %s167_s12, %s257_s13  ;;  %p263_p4 = scmp.lt.s32.totalorder %s257_s13, %s257_s13 }
  0x2b   :  { %202 = vmatpush3.bf16.msra.mxu0 %v199_v4 }
  0x2c   :  { %204 = vmatprep.subr.bf16.mxu0 %v203_v7  ;;  %p264_p5 = por %p263_p4, %p262_p3 }
  0x2e   :  { %v51_v9 = vld [vmem:[#allocation2 + $0x8] sm:$0xff]  ;;  %v50_v10 = vld [vmem:[#allocation2] sm:$0xff]  ;;  %p265_p6 = pnand %p264_p5, %p258_p2 }
  0x2f   :  { %206 = vmatpush3.bf16.msra.mxu0 %v203_v7 }
  0x32   :  { %197 = vmatmul.mubr.msk.f32.vlgmr.msra.gmra.mrb[0].mxu0 %vm58_vm1, %v53_v8 }
 0x105   :  { %v198_v11 = vpop.f32.mrb[0].mxu0 }
 0x106   :  { %v141_v12 = vadd.f32 %v198_v11, %v51_v9  ;;  %v131_v13 = vpop.f32.mrb[1].mxu0 }
 0x107   :  { %v140_v14 = vadd.f32 %v131_v13, %v50_v10 }
 0x108   :  { %144 = vst.msk [vmem:[#allocation2 + $0x8] sm:$0xff] %vm47_vm0, %v141_v12 }
 0x109   :  { %143 = vst.msk [vmem:[#allocation2] sm:$0xff] %vm47_vm0, %v140_v14 }
 0x10f   :  { %v149_v16 = vld [vmem:[#allocation2 + $0x8] sm:$0xff] }
 0x110   :  { %v148_v17 = vld [vmem:[#allocation2] sm:$0xff]  ;;  %v158_v18 = vadd.f32 %v181_v15, %v149_v16 }
 0x111   :  { %v157_v19 = vadd.f32 %v181_v15, %v148_v17 }
 0x112   :  { %160 = vst.msk [vmem:[#allocation8 + $0x8] sm:$0xff] %vm47_vm0, %v158_v18 }
 0x113   :  { %159 = vst.msk [vmem:[#allocation8] sm:$0xff] %vm47_vm0, %v157_v19 }
 0x114   :  { %268 = shalt.err (!%p265_p6)
}
 0x115   :  { %s269_s15 = scalar_lea.hbm %s368_s3, 256 }
 0x116   :  { %p270_p7 = scmp.ne.s32.totalorder %s368_s3, %s269_s15  ;;  %p273_p8 = scmp.lt.u32.totalorder %s269_s15, %s368_s3 }
 0x118   :  { %p275_p9 = pnand %p273_p8, %p270_p7 }
 0x11a   :  { %278 = shalt.err (!%p275_p9)
}
 0x11b   :  { %172 = dma.vmem_to_hbm [thread:$0]  %s167_s12, 256, %s368_s3, [#allocation5], %s286_s22, %s286_s22, %s287_s23  }
 0x11c   :  { %283 = dma.done.wait [#allocation5], 256  }
 0x11d   :  { %284 = vsyncadd [#allocation5], 4294967040 }
 0x11e   :  { %176 = vsyncpa [#allocation4], 1 }
 0x11f   :  { %177 = vsyncpa [#allocation7], 1 }
 0x120   :  { %178 = vsyncpa [#allocation5], 1 }

</bundles_post_ra>
